<compile_context>
chip_gen: v7x
topology: tpu7x:2x2x1
jax: 0.10.0
libtpu: 0.0.40
codegen_flags: <defaults>
</compile_context>

<pallas_src>
import math

import jax
import jax.numpy as jnp
from jax.experimental import pallas as pl
from jax.experimental.pallas import tpu as pltpu


LEAKY_SLOPE = 0.01  # nn.LeakyReLU() default


def _round_up(n, m):
    return ((n + m - 1) // m) * m


def siamese_kernel(x_ref, w1_ref, b1_ref, wct_ref, c_ref, o_ref):
    """One grid step processes a tile of rows of the flattened input.

    x_ref   : (TN, E)    tile of flattened input rows (f32 or bf16)
    w1_ref  : (E, H)     first Linear weight          (x dtype)
    b1_ref  : (1, H)     first Linear bias            (f32)
    wct_ref : (Rp, H)    fused (W2 @ Wout.T).T, rows padded R->Rp with zeros (x dtype)
    c_ref   : (Rp, 1)    fused constant term          (f32)
    o_ref   : (Rp, TN)   transposed output tile (lane-dense: last dim is the row dim)
    """
    # Hidden layer: (TN,E) @ (E,H) with f32 accumulation; bias + LeakyReLU in f32.
    h = jnp.dot(x_ref[...], w1_ref[...], preferred_element_type=jnp.float32)
    h = h + b1_ref[...]
    h = jnp.maximum(h, LEAKY_SLOPE * h)
    # Fused second Linear + per-reference heads, computed transposed so the output's
    # last (lane) dim is the large row dim:  (Rp,H) . (TN,H)^T -> (Rp, TN), f32 accumulation.
    proj_t = jax.lax.dot_general(
        wct_ref[...], h.astype(wct_ref.dtype),
        dimension_numbers=(((1,), (1,)), ((), ())),
        preferred_element_type=jnp.float32)
    o_ref[...] = (c_ref[...] - proj_t).astype(o_ref.dtype)


def _pick_row_tile(N, E, H, Rp, x_itemsize, row_tile, vmem_budget_bytes):
    """Largest lane-aligned row tile fitting the VMEM budget, with >=2 grid steps if possible."""
    assert row_tile % 128 == 0, "row_tile must be a multiple of 128"
    if N <= 128:
        return N  # single full-extent block (block dims equal the full array dims)
    # Per-row VMEM bytes: x (up to triple-buffered), out (double-buffered f32),
    # plus the f32 h=(tn,H) and proj=(Rp,tn) intermediates kept live in VMEM.
    per_row = 3 * E * x_itemsize + 2 * Rp * 4 + H * 4 + Rp * 4
    cap = max(128, (vmem_budget_bytes // per_row) // 128 * 128)
    tn = min(row_tile, cap)
    # Keep >= 2 grid steps when N allows it (v7x: 2 TensorCores share the parallel grid axis).
    half = _round_up(-(-N // 2), 128)
    return max(128, min(tn, half))


def siamese_classifier_forward(x, params, *, row_tile=2048,
                               vmem_budget_bytes=12 * 1024 * 1024):
    """x: (B, S, E) -> (B, S, R) float32.  Pass bf16 x for bf16 MXU operands."""
    B, S, E = x.shape
    N = B * S
    H = params["w1"].shape[1]
    R = params["wout"].shape[0]
    Rp = _round_up(R, 8)

    w1, b1 = params["w1"], params["b1"]
    w2, b2 = params["w2"], params["b2"]
    wout, bout, refs = params["wout"], params["bout"], params["refs"]

    # ---- grid-invariant precompute (plain XLA ops; runs once, outside the kernel) ----
    t = refs @ w1 + b1
    hr = jnp.maximum(t, LEAKY_SLOPE * t)
    yr = hr @ w2 + b2                                             # (R, 64) = MLP(refs)
    wc = w2 @ wout.T                                              # (H, R)
    c = jnp.sum(yr * wout, axis=-1) + bout[0] - b2[0] @ wout.T    # (R,)

    # ---- operand dtypes: matmul operands follow x.dtype; accumulation / constants in f32 ----
    op_dtype = x.dtype
    x_flat = x.reshape(N, E)                                      # free view: no pad, no cast
    w1_c = w1.astype(op_dtype)
    wct_c = jnp.zeros((Rp, H), op_dtype).at[:R].set(wc.T.astype(op_dtype))
    b1_f = b1.astype(jnp.float32)                                 # (1, H)
    c_col = jnp.zeros((Rp, 1), jnp.float32).at[:R, 0].set(c.astype(jnp.float32))

    tn = _pick_row_tile(N, E, H, Rp, x.dtype.itemsize, row_tile, vmem_budget_bytes)
    grid = (pl.cdiv(N, tn),)

    def _call(use_pipeline_modes):
        if use_pipeline_modes:
            w_kw = dict(pipeline_mode=pl.Buffered(1))   # constant-index weights: single buffer
            x_kw = dict(pipeline_mode=pl.Buffered(3))   # streamed rows: deeper pipeline
        else:
            w_kw, x_kw = {}, {}
        const = lambda i: (0, 0)
        return pl.pallas_call(
            siamese_kernel,
            out_shape=jax.ShapeDtypeStruct((Rp, N), jnp.float32),
            grid_spec=pltpu.PrefetchScalarGridSpec(
                num_scalar_prefetch=0,
                grid=grid,
                in_specs=[
                    pl.BlockSpec((tn, E), lambda i: (i, 0), **x_kw),   # x rows (only pipelined stream)
                    pl.BlockSpec((E, H), const, **w_kw),               # W1
                    pl.BlockSpec((1, H), const, **w_kw),               # b1
                    pl.BlockSpec((Rp, H), const, **w_kw),              # (W2 @ Wout.T).T, zero-padded
                    pl.BlockSpec((Rp, 1), const, **w_kw),              # fused constant c
                ],
                out_specs=pl.BlockSpec((Rp, tn), lambda i: (0, i)),    # lane-dense transposed output
            ),
            compiler_params=pltpu.CompilerParams(
                dimension_semantics=("parallel",),
                vmem_limit_bytes=32 * 1024 * 1024),
        )(x_flat, w1_c, b1_f, wct_c, c_col)

    try:
        out_t = _call(True)
    except Exception:
        # Installed JAX rejected pipeline_mode / Buffered: fall back to default double-buffering.
        out_t = _call(False)

    # Drop padded reference rows / OOB tail columns, transpose back to (N, R).
    return out_t[:R, :N].T.reshape(B, S, R)


def bias_init_with_prob(prior_prob):
    return float(-math.log((1.0 - prior_prob) / prior_prob))


def init_params(key, embed_dims, num_references=5, hidden=256, out_dims=64):
    k = jax.random.split(key, 5)
    scale1 = 1.0 / math.sqrt(embed_dims)
    scale2 = 1.0 / math.sqrt(hidden)
    scale3 = 1.0 / math.sqrt(out_dims)
    return {
        # mlp: Linear(E,256) -> LeakyReLU -> Linear(256,64)
        "w1": jax.random.uniform(k[0], (embed_dims, hidden), jnp.float32, -scale1, scale1),
        "b1": jnp.zeros((1, hidden), jnp.float32),
        "w2": jax.random.uniform(k[1], (hidden, out_dims), jnp.float32, -scale2, scale2),
        "b2": jnp.zeros((1, out_dims), jnp.float32),
        # out heads: R x Linear(64, 1), stacked into (R, 64) + (1, R);
        # bias filled with bias_init_with_prob(0.01) as in the module.
        "wout": jax.random.uniform(k[2], (num_references, out_dims), jnp.float32, -scale3, scale3),
        "bout": jnp.full((1, num_references), bias_init_with_prob(0.01), jnp.float32),
        # references: nn.Embedding(R, E) with normal init.
        "refs": jax.random.normal(k[3], (num_references, embed_dims), jnp.float32),
    }


def reference_forward(x, params):
    """Pure-JAX reference mirroring the PyTorch forward."""
    B, S, E = x.shape

    def mlp(v):
        h = v @ params["w1"] + params["b1"]
        h = jnp.where(h >= 0, h, LEAKY_SLOPE * h)
        return h @ params["w2"] + params["b2"]

    y = mlp(x.reshape(B * S, E)).reshape(B, S, -1)              # (B,S,64)
    yr = mlp(params["refs"])                                    # (R,64)
    diff = yr[None, None, :, :] - y[:, :, None, :]              # (B,S,R,64)
    return jnp.einsum("bsrd,rd->bsr", diff, params["wout"]) + params["bout"][0]


if __name__ == "__main__":
    key = jax.random.PRNGKey(0)
    kx, kp, kx2 = jax.random.split(key, 3)

    # --- small case consistent with the module (B=2, S=8, E=32, R=5), f32 ---
    B, S, E, R = 2, 8, 32, 5
    x = jax.random.normal(kx, (B, S, E), jnp.float32)
    params = init_params(kp, embed_dims=E, num_references=R)

    out = jax.block_until_ready(siamese_classifier_forward(x, params))
    ref = reference_forward(x, params)
    assert out.shape == (B, S, R), out.shape
    assert jnp.allclose(out, ref, atol=1e-3, rtol=1e-3), float(jnp.max(jnp.abs(out - ref)))

    # --- ragged-N case (N=333: not a multiple of 8 or of the row tile) exercising
    #     multi-step grid + partial final input/output blocks (no wrapper-side padding) ---
    B2, S2 = 1, 333
    x2 = jax.random.normal(kx2, (B2, S2, E), jnp.float32)
    out2 = jax.block_until_ready(siamese_classifier_forward(x2, params))
    ref2 = reference_forward(x2, params)
    assert out2.shape == (B2, S2, R), out2.shape
    assert jnp.allclose(out2, ref2, atol=1e-3, rtol=1e-3), float(jnp.max(jnp.abs(out2 - ref2)))

    # --- bf16 operand path: x arrives already in bf16 (no extra HBM cast pass added) ---
    out_bf = jax.block_until_ready(
        siamese_classifier_forward(x.astype(jnp.bfloat16), params))
    assert out_bf.shape == (B, S, R), out_bf.shape
    assert jnp.allclose(out_bf, ref, atol=2e-1, rtol=1e-1), float(jnp.max(jnp.abs(out_bf - ref)))

    print("KERNEL_OK")
</pallas_src>

<mosaic_0001>
module attributes {stable_mosaic.version = 11 : i64} {
  func.func @siamese_kernel(%arg0: i32, %arg1: memref<16x32xf32, #tpu.memory_space<vmem>>, %arg2: memref<32x256xf32, #tpu.memory_space<vmem>>, %arg3: memref<1x256xf32, #tpu.memory_space<vmem>>, %arg4: memref<8x256xf32, #tpu.memory_space<vmem>>, %arg5: memref<8x1xf32, #tpu.memory_space<vmem>>, %arg6: memref<8x16xf32, #tpu.memory_space<vmem>>) attributes {dimension_semantics = [#tpu.dimension_semantics<parallel>], iteration_bounds = array<i64: 1>, scalar_prefetch = 0 : i64, scratch_operands = 0 : i64, tpu.core_type = #tpu.core_type<tc>, window_params = [{transform_indices = @transform_0, window_bounds = array<i64: 16, 32>}, {pipeline_mode = #tpu.pipeline_mode<synchronous>, transform_indices = @transform_1, window_bounds = array<i64: 32, 256>}, {pipeline_mode = #tpu.pipeline_mode<synchronous>, transform_indices = @transform_2, window_bounds = array<i64: 1, 256>}, {pipeline_mode = #tpu.pipeline_mode<synchronous>, transform_indices = @transform_3, window_bounds = array<i64: 8, 256>}, {pipeline_mode = #tpu.pipeline_mode<synchronous>, transform_indices = @transform_4, window_bounds = array<i64: 8, 1>}, {transform_indices = @transform_5, window_bounds = array<i64: 8, 16>}]} {
    %c0 = arith.constant 0 : index
    %c0_0 = arith.constant 0 : index
    %0 = vector.load %arg1[%c0, %c0_0] : memref<16x32xf32, #tpu.memory_space<vmem>>, vector<16x32xf32>
    %c0_1 = arith.constant 0 : index
    %c0_2 = arith.constant 0 : index
    %1 = vector.load %arg2[%c0_1, %c0_2] : memref<32x256xf32, #tpu.memory_space<vmem>>, vector<32x256xf32>
    %cst = arith.constant dense<0.000000e+00> : vector<16x256xf32>
    %2 = tpu.matmul %0, %1, %cst {dimension_numbers = #tpu.dot_dimension_numbers<[1], [0], [0], [1], [0, 0, 1, 1], [], []>} : vector<16x32xf32>, vector<32x256xf32>, vector<16x256xf32> -> vector<16x256xf32>
    %c0_3 = arith.constant 0 : index
    %c0_4 = arith.constant 0 : index
    %3 = vector.load %arg3[%c0_3, %c0_4] : memref<1x256xf32, #tpu.memory_space<vmem>>, vector<1x256xf32>
    %4 = vector.broadcast %3 : vector<1x256xf32> to vector<16x256xf32>
    %5 = arith.addf %2, %4 : vector<16x256xf32>
    %cst_5 = arith.constant 0.00999999977 : f32
    %6 = vector.broadcast %cst_5 : f32 to vector<16x256xf32>
    %7 = arith.mulf %6, %5 : vector<16x256xf32>
    %8 = arith.maximumf %5, %7 : vector<16x256xf32>
    %c0_6 = arith.constant 0 : index
    %c0_7 = arith.constant 0 : index
    %9 = vector.load %arg4[%c0_6, %c0_7] : memref<8x256xf32, #tpu.memory_space<vmem>>, vector<8x256xf32>
    %cst_8 = arith.constant dense<0.000000e+00> : vector<8x16xf32>
    %10 = tpu.matmul %9, %8, %cst_8 {dimension_numbers = #tpu.dot_dimension_numbers<[1], [1], [0], [0], [0, 0, 1, 0], [], []>} : vector<8x256xf32>, vector<16x256xf32>, vector<8x16xf32> -> vector<8x16xf32>
    %c0_9 = arith.constant 0 : index
    %c0_10 = arith.constant 0 : index
    %11 = vector.load %arg5[%c0_9, %c0_10] : memref<8x1xf32, #tpu.memory_space<vmem>>, vector<8x1xf32>
    %12 = vector.broadcast %11 : vector<8x1xf32> to vector<8x16xf32>
    %13 = arith.subf %12, %10 : vector<8x16xf32>
    %c0_11 = arith.constant 0 : index
    %c0_12 = arith.constant 0 : index
    %14 = vector.load %arg6[%c0_11, %c0_12] : memref<8x16xf32, #tpu.memory_space<vmem>>, vector<8x16xf32>
    tpu.vector_store %arg6[%c0_11, %c0_12], %13 {strides = array<i32>} : memref<8x16xf32, #tpu.memory_space<vmem>>, vector<8x16xf32>,
    return
  }
  func.func @transform_0(%arg0: i32) -> (i32, i32) {
    %c0_i32 = arith.constant 0 : i32
    %c0_i32_0 = arith.constant 0 : i32
    return %arg0, %c0_i32 : i32, i32
  }
  func.func @transform_1(%arg0: i32) -> (i32, i32) {
    %c0_i32 = arith.constant 0 : i32
    %c0_i32_0 = arith.constant 0 : i32
    %c0_i32_1 = arith.constant 0 : i32
    return %c0_i32, %c0_i32_0 : i32, i32
  }
  func.func @transform_2(%arg0: i32) -> (i32, i32) {
    %c0_i32 = arith.constant 0 : i32
    %c0_i32_0 = arith.constant 0 : i32
    %c0_i32_1 = arith.constant 0 : i32
    return %c0_i32, %c0_i32_0 : i32, i32
  }
  func.func @transform_3(%arg0: i32) -> (i32, i32) {
    %c0_i32 = arith.constant 0 : i32
    %c0_i32_0 = arith.constant 0 : i32
    %c0_i32_1 = arith.constant 0 : i32
    return %c0_i32, %c0_i32_0 : i32, i32
  }
  func.func @transform_4(%arg0: i32) -> (i32, i32) {
    %c0_i32 = arith.constant 0 : i32
    %c0_i32_0 = arith.constant 0 : i32
    %c0_i32_1 = arith.constant 0 : i32
    return %c0_i32, %c0_i32_0 : i32, i32
  }
  func.func @transform_5(%arg0: i32) -> (i32, i32) {
    %c0_i32 = arith.constant 0 : i32
    %c0_i32_0 = arith.constant 0 : i32
    return %c0_i32, %arg0 : i32, i32
  }
}

</mosaic_0001>

<bundles_post_ra>
// kernel: tpu_custom_call.1
= control target key start
LH: loop header
LB: loop body
LE: loop exit
PB: predicated region body
PF: predicated region fallthrough
CT: control target
= control target key end

     0   :  { %10 = vsyncpa [#allocation3], 0  ;;  %s443_s0 = inlined_call_operand.hbm [shape: f32[16,32], index: 0, kind: input, shape index: {}]   ;;  %s444_s1 = inlined_call_operand.hbm [shape: f32[32,256], index: 1, kind: input, shape index: {}]   ;;  %s445_s2 = inlined_call_operand.vmem [shape: f32[1,256], index: 2, kind: input, shape index: {}]   ;;  %s446_s3 = inlined_call_operand.vmem [shape: f32[8,256], index: 3, kind: input, shape index: {}]   ;;  %s447_s4 = inlined_call_operand.vmem [shape: f32[8,1], index: 4, kind: input, shape index: {}]   ;;  %s448_s5 = inlined_call_operand.hbm [shape: f32[8,16], index: 5, kind: output, shape index: {}]  }
   0x1   :  { %11 = vsyncpa [#allocation6], 0 }
   0x2   :  { %12 = vsyncpa [#allocation4], 0  ;;  %s356_s18 = smov [#allocation2]   ;;  %s284_s22 = scalar_lea.hbm %s443_s0, 256 }
   0x3   :  { %s18_s19 = sshll.u32 %s356_s18, 4  ;;  %p285_p0 = scmp.ne.s32.totalorder %s443_s0, %s284_s22  ;;  %s19_s19 = int_to_ptr.vmem [resolvable:$true] %s18_s19 }
   0x4   :  { %p288_p1 = scmp.lt.u32.totalorder %s284_s22, %s443_s0 }
   0x6   :  { %p290_p2 = pnand %p288_p1, %p285_p0 }
   0x8   :  { %293 = shalt.err (!%p290_p2)
}
   0x9   :  { %s294_s27 = scalar_lea.vmem %s19_s19, 256  ;;  %p299_p4 = scmp.lt.s32.totalorder %s19_s19, %s19_s19 }
   0xa   :  { %p295_p3 = scmp.ne.s32.totalorder %s19_s19, %s294_s27  ;;  %p300_p5 = scmp.lt.s32.totalorder %s294_s27, %s294_s27 }
   0xc   :  { %p301_p6 = por %p300_p5, %p299_p4 }
   0xe   :  { %p302_p7 = pnand %p301_p6, %p295_p3 }
  0x10   :  { %305 = shalt.err (!%p302_p7)
}
  0x11   :  { %s357_s28 = smov 128   ;;  %s358_s29 = smov 8  }
  0x12   :  { %24 = dma.hbm_to_vmem [thread:$0]  %s443_s0, 256, %s19_s19, [#allocation3], %s357_s28, %s357_s28, %s358_s29  }
  0x13   :  { %s359_s7 = smov [#allocation5]   ;;  %s306_s11 = scalar_lea.hbm %s444_s1, 1024 }
  0x14   :  { %s30_s8 = sshll.u32 %s359_s7, 4  ;;  %p307_p8 = scmp.ne.s32.totalorder %s444_s1, %s306_s11  ;;  %s31_s8 = int_to_ptr.vmem [resolvable:$true] %s30_s8 }
  0x15   :  { %p310_p9 = scmp.lt.u32.totalorder %s306_s11, %s444_s1 }
  0x17   :  { %p312_p10 = pnand %p310_p9, %p307_p8 }
  0x19   :  { %315 = shalt.err (!%p312_p10)
}
  0x1a   :  { %s316_s16 = scalar_lea.vmem %s31_s8, 1024  ;;  %p321_p12 = scmp.lt.s32.totalorder %s31_s8, %s31_s8 }
  0x1b   :  { %p317_p11 = scmp.ne.s32.totalorder %s31_s8, %s316_s16  ;;  %p322_p13 = scmp.lt.s32.totalorder %s316_s16, %s316_s16 }
  0x1d   :  { %p323_p0 = por %p322_p13, %p321_p12 }
  0x1f   :  { %p324_p1 = pnand %p323_p0, %p317_p11 }
  0x21   :  { %327 = shalt.err (!%p324_p1)
}
  0x22   :  { %s360_s0 = smov 256   ;;  %s361_s17 = smov 16  }
  0x23   :  { %36 = dma.hbm_to_vmem [thread:$0]  %s444_s1, 1024, %s31_s8, [#allocation6], %s360_s0, %s360_s0, %s361_s17  }
  0x24   :  { %350 = dma.done.wait [#allocation3], 256  }
  0x25   :  { %351 = vsyncadd [#allocation3], 4294967040 }
  0x26   :  { %352 = dma.done.wait [#allocation6], 1024  }
  0x27   :  { %353 = vsyncadd [#allocation6], 4294966272  ;;  %v362_v0 = vmov 0.0   ;;  %v52_v1 = vld [vmem:[#allocation5 + $0x8] sm:$0xff]  ;;  %v54_v2 = vld [vmem:[#allocation5 + $0x18] sm:$0xff]  ;;  %vm71_vm0 = vcmask 261120   ;;  %v61_v18 = vlaneseq }
  0x28   :  { %142 = vmatprep.mubr.f32.mxu0 %v362_v0  ;;  %v51_v3 = vld [vmem:[#allocation5] sm:$0xff]  ;;  %v262_v4 = vpack.c.bf16 %v54_v2, %v52_v1  ;;  %v53_v5 = vld [vmem:[#allocation5 + $0x10] sm:$0xff]  ;;  %v56_v6 = vld [vmem:[#allocation5 + $0x28] sm:$0xff]  ;;  %v363_v17 = vmov 0   ;;  %s364_s25 = smov [#allocation7]   ;;  %vm242_vm1 = vcmask 130048  }
  0x29   :  { %v58_v7 = vld [vmem:[#allocation5 + $0x38] sm:$0xff]  ;;  %v264_v8 = vpack.c.bf16 %v53_v5, %v51_v3  ;;  %v55_v10 = vld [vmem:[#allocation5 + $0x20] sm:$0xff]  ;;  %v57_v11 = vld [vmem:[#allocation5 + $0x30] sm:$0xff]  ;;  %283 = vset.pattern.permute.xlu0 %v363_v17  ;;  %v62_v19 = vshrl.u32 %v61_v18, 7  ;;  %s250_s26 = sshll.u32 %s364_s25, 4  ;;  %s251_s26 = int_to_ptr.vmem [resolvable:$true] %s250_s26 }
  0x2a   :  { %v266_v9 = vpack.c.bf16 %v58_v7, %v56_v6  ;;  %263 = vmatprep.subr.bf16.mxu0 %v262_v4  ;;  %v268_v12 = vpack.c.bf16 %v57_v11, %v55_v10  ;;  %v49_v13 = vld [vmem:[#allocation2] sm:$0xff]  ;;  %v50_v14 = vld [vmem:[#allocation2 + $0x8] sm:$0xff]  ;;  %s328_s27 = scalar_lea.vmem %s251_s26, 128  ;;  %p333_p3 = scmp.lt.s32.totalorder %s251_s26, %s251_s26 }
  0x2b   :  { %265 = vmatpush1.bf16.msra.mxu0 %v264_v8  ;;  %v164_v15 = vld [vmem:[%s446_s3 + $0x8] sm:$0xff]  ;;  %v235_v16 = vld [vmem:[%s447_s4] sm:$0xff]  ;;  %v63_v20 = vsub.s32 0, %v62_v19  ;;  %v67_v22 = vsub.s32 1, %v62_v19  ;;  %p329_p2 = scmp.ne.s32.totalorder %s251_s26, %s328_s27  ;;  %p334_p4 = scmp.lt.s32.totalorder %s328_s27, %s328_s27 }
  0x2c   :  { %267 = vmatprep.subr.bf16.mxu0 %v266_v9  ;;  %229 = vmatprep.mubr.f32.mxu1 %v164_v15  ;;  %v59_v21 = vld [vmem:[%s445_s2] sm:$0x3] }
  0x2d   :  { %238 = vperm.xlu0 %283, %v235_v16   ;;  %v64_v23 = vrot.slane %v59_v21, %v63_v20  ;;  %v68_v24 = vrot.slane %v59_v21, %v67_v22  ;;  %v163_v43 = vld [vmem:[%s446_s3] sm:$0xff]  ;;  %p335_p5 = por %p334_p4, %p333_p3 }
  0x2f   :  { %269 = vmatpush1.bf16.msra.mxu0 %v268_v12  ;;  %p336_p6 = pnand %p335_p5, %p329_p2 }
  0x32   :  { %260 = vmatmul.mubr.msk.f32.vlgmr.msra.gmra.mrb[0].mxu0 %vm71_vm0, %v49_v13 }
  0x33   :  { %148 = vmatprep.mubr.f32.mxu0 %v362_v0 }
  0x36   :  { %261 = vmatmul.mubr.msk.f32.gmra.mrb[2].mxu0 %vm71_vm0, %v50_v14 }
  0xac   :  { %v239_v44 = vpop.permute.xlu0 %238 }
 0x105   :  { %v144_v25 = vpop.f32.mrb[0].mxu0 }
 0x106   :  { %v145_v26 = vadd.f32 %v144_v25, %v64_v23  ;;  %v146_v27 = vpop.f32.mrb[1].mxu0 }
 0x107   :  { %v147_v28 = vadd.f32 %v146_v27, %v68_v24 }
 0x108   :  { %v155_v30 = vmul.f32 0.01, %v145_v26 }
 0x109   :  { %v150_v29 = vpop.f32.mrb[2].mxu0  ;;  %v156_v33 = vmul.f32 0.01, %v147_v28 }
 0x10a   :  { %v151_v31 = vadd.f32 %v150_v29, %v64_v23  ;;  %v152_v32 = vpop.f32.mrb[3].mxu0  ;;  %v159_v37 = vmax.f32 %v145_v26, %v155_v30 }
 0x10b   :  { %v153_v34 = vadd.f32 %v152_v32, %v68_v24  ;;  %v160_v39 = vmax.f32 %v147_v28, %v156_v33 }
 0x10c   :  { %v157_v35 = vmul.f32 0.01, %v151_v31 }
 0x10d   :  { %v158_v36 = vmul.f32 0.01, %v153_v34 }
 0x10e   :  { %v161_v38 = vmax.f32 %v151_v31, %v157_v35 }
 0x10f   :  { %v162_v40 = vmax.f32 %v153_v34, %v158_v36 }
 0x110   :  { %v272_v41 = vpack.c.bf16 %v161_v38, %v159_v37 }
 0x111   :  { %v270_v42 = vpack.c.bf16 %v162_v40, %v160_v39 }
 0x113   :  { %271 = vmatprep.subr.bf16.mxu1 %v270_v42 }
 0x114   :  { %273 = vmatpush1.bf16.xpose.msra.mxu1 %v272_v41 }
 0x11b   :  { %230 = vmatmul.mubr.f32.vlgmr.msra.gmra.mrb[0].mxu1 %v163_v43 }
 0x1ee   :  { %v231_v45 = vpop.f32.mrb[0].mxu1 }
 0x1ef   :  { %v241_v46 = vsub.f32 %v239_v44, %v231_v45  ;;  %v233_v47 = vpop.f32.mrb[1].mxu1 }
 0x1f1   :  { %243 = vst.msk [vmem:[#allocation7] sm:$0xff] %vm242_vm1, %v241_v46 }
 0x1f2   :  { %339 = shalt.err (!%p336_p6)
}
 0x1f3   :  { %s340_s3 = scalar_lea.hbm %s448_s5, 128 }
 0x1f4   :  { %p341_p7 = scmp.ne.s32.totalorder %s448_s5, %s340_s3  ;;  %p344_p8 = scmp.lt.u32.totalorder %s340_s3, %s448_s5 }
 0x1f6   :  { %p346_p9 = pnand %p344_p8, %p341_p7 }
 0x1f8   :  { %349 = shalt.err (!%p346_p9)
}
 0x1f9   :  { %253 = dma.vmem_to_hbm [thread:$0]  %s251_s26, 128, %s448_s5, [#allocation4]  }
 0x1fa   :  { %354 = dma.done.wait [#allocation4], 128  }
 0x1fb   :  { %355 = vsyncadd [#allocation4], 4294967168 }
 0x1fc   :  { %257 = vsyncpa [#allocation3], 1 }
 0x1fd   :  { %258 = vsyncpa [#allocation6], 1 }
 0x1fe   :  { %259 = vsyncpa [#allocation4], 1 }

</bundles_post_ra>
